<compile_context>
chip_gen: v7x
topology: tpu7x:2x2x1
jax: 0.10.0
libtpu: 0.0.40
codegen_flags: <defaults>
</compile_context>

<pallas_src>
import functools
import math

import jax
import jax.numpy as jnp
from jax.experimental import pallas as pl
from jax.experimental.pallas import tpu as pltpu


NC_PAD = 128    # class dim padded to 128 lanes for a lane-dense output store
CIN_PAD = 8     # image channels padded 3 -> 8 (one full sublane tile of MXU K)
OUT_ROWS = 8    # per-sample output row block rounded up to 8 sublanes


# ----------------------------------------------------------------------------
# Fused kernel: backbone stand-in + global max-pool + classifier matmul
# ----------------------------------------------------------------------------
def _gcn_resnet_kernel(img_ref, bbw_ref, ht_ref, out_ref, *, hw):
    # img_ref: (1, HW_PAD, CIN_PAD)   one sample per grid step ("parallel" axis)
    # bbw_ref: (CIN_PAD, F)           synthetic 1x1-conv weight (pad rows = 0)
    # ht_ref : (F, NC_PAD)            hoisted GCN classifier matrix (pre-padded)
    # out_ref: (1, OUT_ROWS, NC_PAD)
    x = img_ref[0]                                        # (HW_PAD, CIN_PAD)

    # Backbone stand-in: 1x1 conv == one MXU matmul over the channel dim + ReLU.
    # (Cin sits on lanes of this tile — review option (a); the MXU is idle at
    # these shapes and the ~100 KB VMEM tile vanishes once a real backbone
    # replaces the stand-in.)
    z = jnp.dot(x, bbw_ref[...], preferred_element_type=jnp.float32)  # (HW_PAD, F)
    z = jnp.maximum(z, 0.0)                               # ReLU

    # nn.MaxPool2d(14, 14) + view(N, -1): global spatial max.  Rows >= hw are
    # wrapper padding; mask them with -inf so correctness does NOT depend on
    # the backbone output being non-negative.
    row = jax.lax.broadcasted_iota(jnp.int32, (z.shape[0], 1), 0)
    zm = jnp.where(row < hw, z, -jnp.inf)
    feat = jnp.max(zm, axis=0, keepdims=True)             # (1, F)

    # Classifier: feature @ gc2(...)^T, class dim pre-padded to 128 lanes.
    logits = jnp.dot(feat, ht_ref[...],
                     preferred_element_type=jnp.float32)  # (1, NC_PAD)

    # Row block rounded up to 8 sublanes -> single full (unmasked) vector store;
    # wrapper keeps row 0 and slices the classes back to num_classes.
    out_ref[...] = jnp.broadcast_to(logits, out_ref.shape)


def gcn_resnet_pallas(img_pad, bbw_pad, ht_pad, *, hw):
    n, hw_pad, cin_pad = img_pad.shape
    f = bbw_pad.shape[1]
    kern = functools.partial(_gcn_resnet_kernel, hw=hw)
    out = pl.pallas_call(
        kern,
        out_shape=jax.ShapeDtypeStruct((n, OUT_ROWS, NC_PAD), jnp.float32),
        grid=(n,),
        in_specs=[
            pl.BlockSpec((1, hw_pad, cin_pad), lambda i: (i, 0, 0)),
            pl.BlockSpec((cin_pad, f), lambda i: (0, 0)),
            pl.BlockSpec((f, NC_PAD), lambda i: (0, 0)),
        ],
        out_specs=pl.BlockSpec((1, OUT_ROWS, NC_PAD), lambda i: (i, 0, 0)),
        compiler_params=pltpu.CompilerParams(
            dimension_semantics=("parallel",)),           # v7x: both TCs active
    )(img_pad, bbw_pad, ht_pad)
    return out[:, 0, :]                                   # (N, NC_PAD)


# ----------------------------------------------------------------------------
# Parameter glue + forward
# ----------------------------------------------------------------------------
def _round_up(x, m):
    return (x + m - 1) // m * m


def gen_adj(A, eps=1e-12):
    # gen_adj(A): D = diag(A.sum(1) ** -0.5); adj = (A @ D).T @ D
    d = jnp.power(jnp.maximum(jnp.sum(A, axis=1), eps), -0.5)
    D = jnp.diag(d)
    return (A @ D).T @ D


def init_params(key, num_classes, in_channel, gc1_out, feat_dim):
    k_bb, k_g1, k_g2, k_a = jax.random.split(key, 4)
    # backbone stand-in weight, PyTorch Conv2d-like (out_ch, in_ch) for a 1x1 conv
    backbone_w = 0.1 * jax.random.normal(k_bb, (feat_dim, 3), jnp.float32)
    # GraphConvolution.reset_parameters: uniform(-stdv, stdv), stdv = 1/sqrt(out)
    s1 = 1.0 / math.sqrt(gc1_out)
    gc1_w = jax.random.uniform(k_g1, (in_channel, gc1_out), jnp.float32, -s1, s1)
    s2 = 1.0 / math.sqrt(feat_dim)
    gc2_w = jax.random.uniform(k_g2, (gc1_out, feat_dim), jnp.float32, -s2, s2)
    # adjacency parameter A (deterministic stand-in for gen_A(...))
    A = jnp.eye(num_classes, dtype=jnp.float32) + 0.25 * jax.random.uniform(
        k_a, (num_classes, num_classes), jnp.float32)
    return {"backbone_w": backbone_w, "gc1_w": gc1_w, "gc2_w": gc2_w, "A": A}


@jax.jit
def gcn_resnet_forward(params, image_nhwc, inp):
    # image_nhwc: (N, H, W, 3) channel-last (kernel requires channel-last input
    # per review, so no NCHW transpose is materialized anywhere).
    n, h, w, cin = image_nhwc.shape
    hw = h * w
    hw_pad = _round_up(hw, 8)

    # Only image-touching wrapper op: free reshape + ONE small zero-pad
    # (HW -> multiple of 8 sublanes, channels -> full 8-row contracting tile).
    x = image_nhwc.reshape(n, hw, cin)
    x = jnp.pad(x, ((0, 0), (0, hw_pad - hw), (0, CIN_PAD - cin)))

    bbw = jnp.pad(params["backbone_w"].T,
                  ((0, CIN_PAD - cin), (0, 0)))           # (CIN_PAD, F), pad rows 0

    # Image-independent GCN branch, hoisted out of the Pallas kernel (review):
    #   adj = gen_adj(self.A); x = gc2(LeakyReLU(gc1(inp[0], adj)), adj)
    adj = gen_adj(params["A"])
    g = jnp.dot(adj, jnp.dot(inp[0], params["gc1_w"]))    # gc1
    g = jnp.where(g >= 0.0, g, 0.2 * g)                   # LeakyReLU(0.2)
    g = jnp.dot(adj, jnp.dot(g, params["gc2_w"]))         # gc2 -> (NC, F)
    nc = g.shape[0]
    ht_pad = jnp.pad(g, ((0, NC_PAD - nc), (0, 0))).T     # (F, NC_PAD), pad cols 0

    out = gcn_resnet_pallas(x, bbw, ht_pad, hw=hw)        # (N, NC_PAD)
    return out[:, :nc]                                    # (N, num_classes)


def _reference_forward(params, image_nhwc, inp):
    # Pure-JAX reference mirroring the PyTorch forward (sanity check only).
    n, h, w, cin = image_nhwc.shape
    x = image_nhwc.reshape(n * h * w, cin)
    feat = jnp.maximum(x @ params["backbone_w"].T, 0.0)
    feat = feat.reshape(n, h * w, -1).max(axis=1)
    adj = gen_adj(params["A"])
    g = adj @ (inp[0] @ params["gc1_w"])
    g = jnp.where(g >= 0.0, g, 0.2 * g)
    g = adj @ (g @ params["gc2_w"])
    return feat @ g.T


if __name__ == "__main__":
    num_classes = 8
    in_channel = 32
    gc1_out = 64
    feat_dim = 128
    N, H, W = 2, 14, 14

    key = jax.random.PRNGKey(0)
    k_params, k_img, k_inp = jax.random.split(key, 3)

    params = init_params(k_params, num_classes, in_channel, gc1_out, feat_dim)
    image = jax.random.normal(k_img, (N, H, W, 3), jnp.float32)        # NHWC
    inp = jax.random.normal(k_inp, (1, num_classes, in_channel), jnp.float32)

    out = gcn_resnet_forward(params, image, inp)
    out = jax.block_until_ready(out)
    assert out.shape == (N, num_classes), out.shape
    assert bool(jnp.all(jnp.isfinite(out)))

    ref = _reference_forward(params, image, inp)
    assert jnp.allclose(out, ref, rtol=2e-2, atol=2e-2), (
        float(jnp.max(jnp.abs(out - ref))))
    print("KERNEL_OK")
</pallas_src>

<mosaic_0001>
module attributes {stable_mosaic.version = 11 : i64} {
  func.func @_gcn_resnet_kernel(%arg0: i32, %arg1: memref<1x200x8xf32, #tpu.memory_space<vmem>>, %arg2: memref<8x128xf32, #tpu.memory_space<vmem>>, %arg3: memref<128x128xf32, #tpu.memory_space<vmem>>, %arg4: memref<1x8x128xf32, #tpu.memory_space<vmem>>) attributes {dimension_semantics = [#tpu.dimension_semantics<parallel>], iteration_bounds = array<i64: 2>, scalar_prefetch = 0 : i64, scratch_operands = 0 : i64, tpu.core_type = #tpu.core_type<tc>, window_params = [{transform_indices = @transform_0, window_bounds = array<i64: 1, 200, 8>}, {pipeline_mode = #tpu.pipeline_mode<synchronous>, transform_indices = @transform_1, window_bounds = array<i64: 8, 128>}, {pipeline_mode = #tpu.pipeline_mode<synchronous>, transform_indices = @transform_2, window_bounds = array<i64: 128, 128>}, {transform_indices = @transform_3, window_bounds = array<i64: 1, 8, 128>}]} {
    %c0 = arith.constant 0 : index
    %c0_0 = arith.constant 0 : index
    %c0_1 = arith.constant 0 : index
    %0 = vector.load %arg1[%c0, %c0_0, %c0_1] : memref<1x200x8xf32, #tpu.memory_space<vmem>>, vector<1x200x8xf32>
    %1 = vector.shape_cast %0 : vector<1x200x8xf32> to vector<200x8xf32>
    %c0_2 = arith.constant 0 : index
    %c0_3 = arith.constant 0 : index
    %2 = vector.load %arg2[%c0_2, %c0_3] : memref<8x128xf32, #tpu.memory_space<vmem>>, vector<8x128xf32>
    %cst = arith.constant dense<0.000000e+00> : vector<200x128xf32>
    %3 = tpu.matmul %1, %2, %cst {dimension_numbers = #tpu.dot_dimension_numbers<[1], [0], [0], [1], [0, 0, 1, 1], [], []>} : vector<200x8xf32>, vector<8x128xf32>, vector<200x128xf32> -> vector<200x128xf32>
    %cst_4 = arith.constant 0.000000e+00 : f32
    %4 = vector.broadcast %cst_4 : f32 to vector<200x128xf32>
    %5 = arith.maximumf %3, %4 : vector<200x128xf32>
    %6 = tpu.iota {dimensions = array<i32: 0>} : vector<200x1xi32>
    %c196_i32 = arith.constant 196 : i32
    %7 = vector.broadcast %c196_i32 : i32 to vector<200x1xi32>
    %8 = arith.cmpi slt, %6, %7 : vector<200x1xi32>
    %cst_5 = arith.constant 0xFF800000 : f32
    %9 = vector.shape_cast %8 : vector<200x1xi1> to vector<200x1xi1>
    %10 = vector.broadcast %9 : vector<200x1xi1> to vector<200x128xi1>
    %11 = vector.broadcast %cst_5 : f32 to vector<200x128xf32>
    %12 = arith.select %10, %5, %11 : vector<200x128xi1>, vector<200x128xf32>
    %cst_6 = arith.constant dense<0xFF800000> : vector<128xf32>
    %13 = vector.multi_reduction <maximumf>, %12, %cst_6 [0] : vector<200x128xf32> to vector<128xf32>
    %14 = vector.shape_cast %13 : vector<128xf32> to vector<1x128xf32>
    %c0_7 = arith.constant 0 : index
    %c0_8 = arith.constant 0 : index
    %15 = vector.load %arg3[%c0_7, %c0_8] : memref<128x128xf32, #tpu.memory_space<vmem>>, vector<128x128xf32>
    %cst_9 = arith.constant dense<0.000000e+00> : vector<1x128xf32>
    %16 = tpu.matmul %14, %15, %cst_9 {dimension_numbers = #tpu.dot_dimension_numbers<[1], [0], [0], [1], [0, 0, 1, 1], [], []>} : vector<1x128xf32>, vector<128x128xf32>, vector<1x128xf32> -> vector<1x128xf32>
    %17 = vector.shape_cast %16 : vector<1x128xf32> to vector<1x1x128xf32>
    %18 = vector.broadcast %17 : vector<1x1x128xf32> to vector<1x8x128xf32>
    %c0_10 = arith.constant 0 : index
    %c0_11 = arith.constant 0 : index
    %c0_12 = arith.constant 0 : index
    %19 = vector.load %arg4[%c0_10, %c0_11, %c0_12] : memref<1x8x128xf32, #tpu.memory_space<vmem>>, vector<1x8x128xf32>
    tpu.vector_store %arg4[%c0_10, %c0_11, %c0_12], %18 {strides = array<i32>} : memref<1x8x128xf32, #tpu.memory_space<vmem>>, vector<1x8x128xf32>,
    return
  }
  func.func @transform_0(%arg0: i32) -> (i32, i32, i32) {
    %c0_i32 = arith.constant 0 : i32
    %c0_i32_0 = arith.constant 0 : i32
    %c0_i32_1 = arith.constant 0 : i32
    return %arg0, %c0_i32, %c0_i32_0 : i32, i32, i32
  }
  func.func @transform_1(%arg0: i32) -> (i32, i32) {
    %c0_i32 = arith.constant 0 : i32
    %c0_i32_0 = arith.constant 0 : i32
    %c0_i32_1 = arith.constant 0 : i32
    return %c0_i32, %c0_i32_0 : i32, i32
  }
  func.func @transform_2(%arg0: i32) -> (i32, i32) {
    %c0_i32 = arith.constant 0 : i32
    %c0_i32_0 = arith.constant 0 : i32
    %c0_i32_1 = arith.constant 0 : i32
    return %c0_i32, %c0_i32_0 : i32, i32
  }
  func.func @transform_3(%arg0: i32) -> (i32, i32, i32) {
    %c0_i32 = arith.constant 0 : i32
    %c0_i32_0 = arith.constant 0 : i32
    %c0_i32_1 = arith.constant 0 : i32
    return %arg0, %c0_i32, %c0_i32_0 : i32, i32, i32
  }
}

</mosaic_0001>

<bundles_post_ra>
// kernel: gcn_resnet_forward.1
= control target key start
LH: loop header
LB: loop body
LE: loop exit
PB: predicated region body
PF: predicated region fallthrough
CT: control target
= control target key end

     0   :  { %s1044_s12 = smov 0   ;;  %s1231_s0 = inlined_call_operand.vmem [shape: f32[2,200,8], index: 0, kind: input, shape index: {}]   ;;  %s1232_s1 = inlined_call_operand.vmem [shape: f32[8,128], index: 1, kind: input, shape index: {}]   ;;  %s1233_s2 = inlined_call_operand.vmem [shape: f32[128,128], index: 2, kind: input, shape index: {}]   ;;  %s1234_s3 = inlined_call_operand.vmem [shape: f32[2,8,128], index: 3, kind: output, shape index: {}]  }
   0x1 LB: > { %s786_s13 = sadd.s32 4294967295, %s1019_s12   ;;  %p790_p0 = scmp.ge.s32.totalorder %s1019_s12, 1  ;;  %s1019_s12 = sphi %s1044_s12, %s13_s12  }
   0x2   : > { %p137_p1 = scmp.lt.s32.totalorder %s1019_s12, 3 }
   0x4   : > { %p138_p2 = pnand %p790_p0, %p137_p1 }
   0x5   : > { %v194_v0 = vld [vmem:[%s1232_s1] sm:$0xff] (!%p138_p2)  ;;  %p160_p3 = scmp.lt.s32.totalorder (!%p138_p2), %s786_s13, 1  ;;  %v1021_v1 = vmov (!%p138_p2), 0.0   ;;  %vm1022_vm0 = vmmov (!%p138_p2), 0   ;;  %vm195_vm1 = vcmask (!%p138_p2), 64512   ;;  %v643_v28 = vld [vmem:[%s1233_s2 + $0x8] sm:$0xff] (!%p138_p2) }
   0x6   : > { %141 = sbr.rel (%p138_p2) target bundleno = 519 (0x207), region = 32  ;;  %863 = vmatprep.subr.mxu0 (!%p138_p2), %v1021_v1  ;;  %865 = vmatprep.mubr.msk.f32.mxu0 (!%p138_p2), %vm1022_vm0, %v1021_v1  ;;  %v642_v27 = vld [vmem:[%s1233_s2] sm:$0xff] (!%p138_p2)  ;;  %v1023_v29 = vmov (!%p138_p2), 0.0|0.0   ;;  %v644_v31 = vld [vmem:[%s1233_s2 + $0x10] sm:$0xff] (!%p138_p2)  ;;  %v645_v32 = vld [vmem:[%s1233_s2 + $0x18] sm:$0xff] (!%p138_p2) }
   0x7   : > { %864 = vmatpush3.msra.mxu0 (!%p138_p2), %v194_v0  ;;  %999 = vmatprep.subr.mxu1 (!%p138_p2), %v1021_v1  ;;  %v976_v30 = vpack.c.bf16 (!%p138_p2), %v643_v28, %v642_v27  ;;  %v979_v33 = vpack.c.bf16 (!%p138_p2), %v645_v32, %v644_v31  ;;  %v646_v34 = vld [vmem:[%s1233_s2 + $0x20] sm:$0xff] (!%p138_p2)  ;;  %v647_v35 = vld [vmem:[%s1233_s2 + $0x28] sm:$0xff] (!%p138_p2)  ;;  %v648_v37 = vld [vmem:[%s1233_s2 + $0x30] sm:$0xff] (!%p138_p2) }
   0x8   : > { %1000 = vmatpush3.msra.mxu1 (!%p138_p2), %v194_v0  ;;  %904 = vmatprep.mubr.msk.f32.mxu1 (!%p138_p2), %vm1022_vm0, %v1021_v1  ;;  %v982_v36 = vpack.c.bf16 (!%p138_p2), %v647_v35, %v646_v34  ;;  %v649_v38 = vld [vmem:[%s1233_s2 + $0x38] sm:$0xff] (!%p138_p2)  ;;  %v650_v40 = vld [vmem:[%s1233_s2 + $0x40] sm:$0xff] (!%p138_p2)  ;;  %v651_v41 = vld [vmem:[%s1233_s2 + $0x48] sm:$0xff] (!%p138_p2) }
   0x9   : > { %975 = vmatprep.subr.bf16.mxu1 (!%p138_p2), %v1023_v29  ;;  %v985_v39 = vpack.c.bf16 (!%p138_p2), %v649_v38, %v648_v37  ;;  %v988_v42 = vpack.c.bf16 (!%p138_p2), %v651_v41, %v650_v40  ;;  %v652_v43 = vld [vmem:[%s1233_s2 + $0x50] sm:$0xff] (!%p138_p2)  ;;  %v653_v44 = vld [vmem:[%s1233_s2 + $0x58] sm:$0xff] (!%p138_p2)  ;;  %v654_v46 = vld [vmem:[%s1233_s2 + $0x60] sm:$0xff] (!%p138_p2) }
   0xa   : > { %v991_v45 = vpack.c.bf16 (!%p138_p2), %v653_v44, %v652_v43  ;;  %v655_v47 = vld [vmem:[%s1233_s2 + $0x68] sm:$0xff] (!%p138_p2)  ;;  %v656_v49 = vld [vmem:[%s1233_s2 + $0x70] sm:$0xff] (!%p138_p2)  ;;  %v657_v50 = vld [vmem:[%s1233_s2 + $0x78] sm:$0xff] (!%p138_p2) }
   0xb   : > { %v994_v48 = vpack.c.bf16 (!%p138_p2), %v655_v47, %v654_v46  ;;  %v997_v51 = vpack.c.bf16 (!%p138_p2), %v657_v50, %v656_v49 }
   0xd   : > { %s1236_s13 = smov (!%p160_p3, %s786_s13), 1 }
   0xe   : > { %s1001_s16 = smul.u32 200, %s1236_s13  ;;  %s792_s27 = sshll.u32 %s1236_s13, 3 }
   0xf   : > { %s168_s30 = scalar_lea.vmem %s1234_s3, %s792_s27 }
  0x10   : > { %s1067_s19 = scalar_lea.vmem %s1231_s0, %s1001_s16 }
  0x11   : > { %v169_v2 = vld [vmem:[%s1067_s19] sm:$0xff]  ;;  %v182_v3 = vld [vmem:[%s1067_s19 + $0x68] sm:$0xff]  ;;  %v183_v5 = vld [vmem:[%s1067_s19 + $0x70] sm:$0xff] }
  0x12   : > { %866 = vmatmul.mubr.msk.f32.vlgmr.msra.gmra.mrb[0].mxu0 %vm195_vm1, %v169_v2  ;;  %v170_v4 = vld [vmem:[%s1067_s19 + $0x8] sm:$0xff]  ;;  %905 = vmatmul.mubr.msk.f32.vlgmr.msra.gmra.mrb[0].mxu1 %vm195_vm1, %v182_v3  ;;  %v171_v6 = vld [vmem:[%s1067_s19 + $0x10] sm:$0xff]  ;;  %v184_v7 = vld [vmem:[%s1067_s19 + $0x78] sm:$0xff] }
  0x13   : > { %868 = vmatprep.mubr.msk.f32.mxu0 %vm1022_vm0, %v1021_v1  ;;  %907 = vmatprep.mubr.msk.f32.mxu1 %vm1022_vm0, %v1021_v1  ;;  %v172_v8 = vld [vmem:[%s1067_s19 + $0x18] sm:$0xff]  ;;  %v185_v9 = vld [vmem:[%s1067_s19 + $0x80] sm:$0xff]  ;;  %v186_v11 = vld [vmem:[%s1067_s19 + $0x88] sm:$0xff] }
  0x14   : > { %v173_v10 = vld [vmem:[%s1067_s19 + $0x20] sm:$0xff]  ;;  %v174_v12 = vld [vmem:[%s1067_s19 + $0x28] sm:$0xff]  ;;  %v187_v13 = vld [vmem:[%s1067_s19 + $0x90] sm:$0xff]  ;;  %977 = vmatpush3.bf16.msra.mxu1 %v976_v30 }
  0x15   : > { %v175_v14 = vld [vmem:[%s1067_s19 + $0x30] sm:$0xff]  ;;  %v188_v15 = vld [vmem:[%s1067_s19 + $0x98] sm:$0xff]  ;;  %v189_v17 = vld [vmem:[%s1067_s19 + $0xa0] sm:$0xff]  ;;  %978 = vmatprep.subr.bf16.mxu1 %v1023_v29 }
  0x16   : > { %869 = vmatmul.mubr.msk.f32.gmra.mrb[2].mxu0 %vm195_vm1, %v170_v4  ;;  %908 = vmatmul.mubr.msk.f32.gmra.mrb[2].mxu1 %vm195_vm1, %v183_v5  ;;  %v176_v16 = vld [vmem:[%s1067_s19 + $0x38] sm:$0xff]  ;;  %v177_v18 = vld [vmem:[%s1067_s19 + $0x40] sm:$0xff]  ;;  %v190_v19 = vld [vmem:[%s1067_s19 + $0xa8] sm:$0xff] }
  0x17   : > { %871 = vmatprep.mubr.msk.f32.mxu0 %vm1022_vm0, %v1021_v1  ;;  %910 = vmatprep.mubr.msk.f32.mxu1 %vm1022_vm0, %v1021_v1  ;;  %v178_v20 = vld [vmem:[%s1067_s19 + $0x48] sm:$0xff]  ;;  %v191_v21 = vld [vmem:[%s1067_s19 + $0xb0] sm:$0xff]  ;;  %v192_v23 = vld [vmem:[%s1067_s19 + $0xb8] sm:$0xff] }
  0x18   : > { %v179_v22 = vld [vmem:[%s1067_s19 + $0x50] sm:$0xff]  ;;  %v180_v24 = vld [vmem:[%s1067_s19 + $0x58] sm:$0xff]  ;;  %v193_v25 = vld [vmem:[%s1067_s19 + $0xc0] sm:$0xff]  ;;  %980 = vmatpush3.bf16.msra.mxu1 %v979_v33 }
  0x19   : > { %v181_v26 = vld [vmem:[%s1067_s19 + $0x60] sm:$0xff]  ;;  %981 = vmatprep.subr.bf16.mxu1 %v1023_v29 }
  0x1a   : > { %872 = vmatmul.mubr.msk.f32.gmra.mrb[4].mxu0 %vm195_vm1, %v171_v6  ;;  %911 = vmatmul.mubr.msk.f32.gmra.mrb[4].mxu1 %vm195_vm1, %v184_v7 }
  0x1b   : > { %874 = vmatprep.mubr.msk.f32.mxu0 %vm1022_vm0, %v1021_v1  ;;  %913 = vmatprep.mubr.msk.f32.mxu1 %vm1022_vm0, %v1021_v1 }
  0x1c   : > { %983 = vmatpush3.bf16.msra.mxu1 %v982_v36 }
  0x1d   : > { %984 = vmatprep.subr.bf16.mxu1 %v1023_v29 }
  0x1e   : > { %875 = vmatmul.mubr.msk.f32.gmra.mrb[6].mxu0 %vm195_vm1, %v172_v8  ;;  %914 = vmatmul.mubr.msk.f32.gmra.mrb[6].mxu1 %vm195_vm1, %v185_v9 }
  0x1f   : > { %877 = vmatprep.mubr.msk.f32.mxu0 %vm1022_vm0, %v1021_v1  ;;  %916 = vmatprep.mubr.msk.f32.mxu1 %vm1022_vm0, %v1021_v1 }
  0x20   : > { %986 = vmatpush3.bf16.msra.mxu1 %v985_v39 }
  0x21   : > { %987 = vmatprep.subr.bf16.mxu1 %v1023_v29 }
  0x22   : > { %878 = vmatmul.mubr.msk.f32.gmra.mrb[8].mxu0 %vm195_vm1, %v173_v10  ;;  %917 = vmatmul.mubr.msk.f32.gmra.mrb[8].mxu1 %vm195_vm1, %v186_v11 }
  0x23   : > { %880 = vmatprep.mubr.msk.f32.mxu0 %vm1022_vm0, %v1021_v1  ;;  %919 = vmatprep.mubr.msk.f32.mxu1 %vm1022_vm0, %v1021_v1 }
  0x24   : > { %989 = vmatpush3.bf16.msra.mxu1 %v988_v42 }
  0x25   : > { %990 = vmatprep.subr.bf16.mxu1 %v1023_v29 }
  0x26   : > { %881 = vmatmul.mubr.msk.f32.gmra.mrb[10].mxu0 %vm195_vm1, %v174_v12  ;;  %920 = vmatmul.mubr.msk.f32.gmra.mrb[10].mxu1 %vm195_vm1, %v187_v13 }
  0x27   : > { %883 = vmatprep.mubr.msk.f32.mxu0 %vm1022_vm0, %v1021_v1  ;;  %922 = vmatprep.mubr.msk.f32.mxu1 %vm1022_vm0, %v1021_v1 }
  0x28   : > { %992 = vmatpush3.bf16.msra.mxu1 %v991_v45  ;;  %v486_v45 = vlaneseq }
  0x29   : > { %993 = vmatprep.subr.bf16.mxu1 %v1023_v29 }
  0x2a   : > { %884 = vmatmul.mubr.msk.f32.gmra.mrb[12].mxu0 %vm195_vm1, %v175_v14  ;;  %923 = vmatmul.mubr.msk.f32.gmra.mrb[12].mxu1 %vm195_vm1, %v188_v15 }
  0x2b   : > { %886 = vmatprep.mubr.msk.f32.mxu0 %vm1022_vm0, %v1021_v1  ;;  %925 = vmatprep.mubr.msk.f32.mxu1 %vm1022_vm0, %v1021_v1 }
  0x2c   : > { %995 = vmatpush3.bf16.msra.mxu1 %v994_v48 }
  0x2d   : > { %996 = vmatprep.subr.bf16.mxu1 %v1023_v29 }
  0x2e   : > { %887 = vmatmul.mubr.msk.f32.gmra.mrb[14].mxu0 %vm195_vm1, %v176_v16  ;;  %926 = vmatmul.mubr.msk.f32.gmra.mrb[14].mxu1 %vm195_vm1, %v189_v17 }
  0x2f   : > { %889 = vmatprep.mubr.msk.f32.mxu0 %vm1022_vm0, %v1021_v1  ;;  %928 = vmatprep.mubr.msk.f32.mxu1 %vm1022_vm0, %v1021_v1 }
  0x30   : > { %998 = vmatpush3.bf16.msra.mxu1 %v997_v51 }
  0x32   : > { %890 = vmatmul.mubr.msk.f32.gmra.mrb[16].mxu0 %vm195_vm1, %v177_v18  ;;  %929 = vmatmul.mubr.msk.f32.gmra.mrb[16].mxu1 %vm195_vm1, %v190_v19 }
  0x33   : > { %892 = vmatprep.mubr.msk.f32.mxu0 %vm1022_vm0, %v1021_v1  ;;  %931 = vmatprep.mubr.msk.f32.mxu1 %vm1022_vm0, %v1021_v1 }
  0x36   : > { %893 = vmatmul.mubr.msk.f32.gmra.mrb[18].mxu0 %vm195_vm1, %v178_v20  ;;  %932 = vmatmul.mubr.msk.f32.gmra.mrb[18].mxu1 %vm195_vm1, %v191_v21 }
  0x37   : > { %895 = vmatprep.mubr.msk.f32.mxu0 %vm1022_vm0, %v1021_v1  ;;  %934 = vmatprep.mubr.msk.f32.mxu1 %vm1022_vm0, %v1021_v1 }
  0x3a   : > { %896 = vmatmul.mubr.msk.f32.gmra.mrb[20].mxu0 %vm195_vm1, %v179_v22  ;;  %935 = vmatmul.mubr.msk.f32.gmra.mrb[20].mxu1 %vm195_vm1, %v192_v23 }
  0x3b   : > { %898 = vmatprep.mubr.msk.f32.mxu0 %vm1022_vm0, %v1021_v1  ;;  %937 = vmatprep.mubr.msk.f32.mxu1 %vm1022_vm0, %v1021_v1 }
  0x3e   : > { %899 = vmatmul.mubr.msk.f32.gmra.mrb[22].mxu0 %vm195_vm1, %v180_v24  ;;  %938 = vmatmul.mubr.msk.f32.gmra.mrb[22].mxu1 %vm195_vm1, %v193_v25 }
  0x3f   : > { %901 = vmatprep.mubr.msk.f32.mxu0 %vm1022_vm0, %v1021_v1  ;;  %972 = vmatprep.mubr.msk.f32.mxu1 %vm1022_vm0, %v1021_v1 }
  0x42   : > { %902 = vmatmul.mubr.msk.f32.gmra.mrb[24].mxu0 %vm195_vm1, %v181_v26 }
  0xe5   : > { %v337_v52 = vpop.f32.mrb[0].mxu0  ;;  %v402_v54 = vpop.f32.mrb[0].mxu1 }
  0xe6   : > { %v867_v53 = vpop.f32.mrb[1].mxu0  ;;  %v906_v55 = vpop.f32.mrb[1].mxu1  ;;  %v461_v5 = vmax.f32 %v337_v52, 0.0  ;;  %v474_v43 = vmax.f32 %v402_v54, 0.0 }
  0xe9   : > { %v342_v56 = vpop.f32.mrb[2].mxu0  ;;  %v1215_v58 = vpop.f32.mrb[2].mxu1 }
  0xea   : > { %v870_v57 = vpop.f32.mrb[3].mxu0  ;;  %v909_v59 = vpop.f32.mrb[3].mxu1  ;;  %v462_v12 = vmax.f32 %v342_v56, 0.0  ;;  %v475_v55 = vmax.f32 %v1215_v58, 0.0 }
  0xeb   : > { %v487_v59 = vshrl.u32 %v486_v45, 7 }
  0xed   : > { %v347_v60 = vpop.f32.mrb[4].mxu0  ;;  %v1217_v62 = vpop.f32.mrb[4].mxu1 }
  0xee   : > { %v873_v61 = vpop.f32.mrb[5].mxu0  ;;  %v912_v63 = vpop.f32.mrb[5].mxu1  ;;  %v463_v19 = vmax.f32 %v347_v60, 0.0 }
  0xf1   : > { %v352_v0 = vpop.f32.mrb[6].mxu0  ;;  %v1219_v2 = vpop.f32.mrb[6].mxu1 }
  0xf2   : > { %v876_v1 = vpop.f32.mrb[7].mxu0  ;;  %v915_v3 = vpop.f32.mrb[7].mxu1  ;;  %v464_v26 = vmax.f32 %v352_v0, 0.0 }
  0xf5   : > { %v357_v4 = vpop.f32.mrb[8].mxu0  ;;  %v422_v8 = vpop.f32.mrb[8].mxu1 }
  0xf6   : > { %v465_v6 = vmax.f32 %v357_v4, 0.0  ;;  %v879_v7 = vpop.f32.mrb[9].mxu0  ;;  %v918_v9 = vpop.f32.mrb[9].mxu1  ;;  %v478_v47 = vmax.f32 %v422_v8, 0.0 }
  0xf7   : > { %v511_v9 = vadd.s32 192, %v487_v59 }
  0xf8   : > { %v612_v10 = vmax.f32 %v461_v5, %v465_v6  ;;  %v476_v6 = vmax.f32 %v1217_v62, 0.0 }
  0xf9   : > { %v362_v11 = vpop.f32.mrb[10].mxu0  ;;  %v427_v15 = vpop.f32.mrb[10].mxu1  ;;  %vm536_vm2 = vcmp.lt.s32.totalorder %v511_v9, 196 }
  0xfa   : > { %v466_v13 = vmax.f32 %v362_v11, 0.0  ;;  %v882_v14 = vpop.f32.mrb[11].mxu0  ;;  %v921_v16 = vpop.f32.mrb[11].mxu1  ;;  %v479_v60 = vmax.f32 %v427_v15, 0.0 }
  0xfc   : > { %v613_v17 = vmax.f32 %v462_v12, %v466_v13 }
  0xfd   : > { %v367_v18 = vpop.f32.mrb[12].mxu0  ;;  %v432_v22 = vpop.f32.mrb[12].mxu1 }
  0xfe   : > { %v467_v20 = vmax.f32 %v367_v18, 0.0  ;;  %v885_v21 = vpop.f32.mrb[13].mxu0  ;;  %v924_v23 = vpop.f32.mrb[13].mxu1 }
 0x100   : > { %v614_v24 = vmax.f32 %v463_v19, %v467_v20 }
 0x101   : > { %v372_v25 = vpop.f32.mrb[14].mxu0  ;;  %v437_v29 = vpop.f32.mrb[14].mxu1 }
 0x102   : > { %v468_v27 = vmax.f32 %v372_v25, 0.0  ;;  %v888_v28 = vpop.f32.mrb[15].mxu0  ;;  %v927_v30 = vpop.f32.mrb[15].mxu1  ;;  %v481_v20 = vmax.f32 %v437_v29, 0.0 }
 0x104   : > { %v615_v31 = vmax.f32 %v464_v26, %v468_v27 }
 0x105   : > { %v377_v32 = vpop.f32.mrb[16].mxu0  ;;  %v442_v35 = vpop.f32.mrb[16].mxu1 }
 0x106   : > { %v469_v33 = vmax.f32 %v377_v32, 0.0  ;;  %v891_v34 = vpop.f32.mrb[17].mxu0  ;;  %v930_v36 = vpop.f32.mrb[17].mxu1  ;;  %v482_v50 = vmax.f32 %v442_v35, 0.0 }
 0x108   : > { %v616_v37 = vmax.f32 %v612_v10, %v469_v33  ;;  %v480_v10 = vmax.f32 %v432_v22, 0.0 }
 0x109   : > { %v382_v38 = vpop.f32.mrb[18].mxu0  ;;  %v447_v41 = vpop.f32.mrb[18].mxu1 }
 0x10a   : > { %v470_v39 = vmax.f32 %v382_v38, 0.0  ;;  %v894_v40 = vpop.f32.mrb[19].mxu0  ;;  %v933_v42 = vpop.f32.mrb[19].mxu1  ;;  %v483_v1 = vmax.f32 %v447_v41, 0.0 }
 0x10c   : > { %v617_v44 = vmax.f32 %v613_v17, %v470_v39  ;;  %v477_v17 = vmax.f32 %v1219_v2, 0.0  ;;  %v730_v2 = vsub.s32 0, %v487_v59 }
 0x10d   : > { %v387_v46 = vpop.f32.mrb[20].mxu0  ;;  %v452_v52 = vpop.f32.mrb[20].mxu1 }
 0x10e   : > { %v621_v48 = vmax.f32 %v617_v44, %v474_v43  ;;  %v471_v49 = vmax.f32 %v387_v46, 0.0  ;;  %v897_v51 = vpop.f32.mrb[21].mxu0  ;;  %v936_v53 = vpop.f32.mrb[21].mxu1  ;;  %v484_v14 = vmax.f32 %v452_v52, 0.0 }
 0x110   : > { %v618_v56 = vmax.f32 %v614_v24, %v471_v49  ;;  %v625_v57 = vmax.f32 %v621_v48, %v478_v47 }
 0x111   : > { %v392_v61 = vpop.f32.mrb[22].mxu0  ;;  %v457_v4 = vpop.f32.mrb[22].mxu1 }
 0x112   : > { %v622_v63 = vmax.f32 %v618_v56, %v475_v55  ;;  %v629_v0 = vmax.f32 %v625_v57, %v482_v50  ;;  %v472_v54 = vmax.f32 %v392_v61, 0.0  ;;  %v900_v3 = vpop.f32.mrb[23].mxu0  ;;  %v939_v5 = vpop.f32.mrb[23].mxu1  ;;  %v485_v16 = vmax.f32 %v457_v4, 0.0 }
 0x114   : > { %v619_v7 = vmax.f32 %v615_v31, %v472_v54  ;;  %v626_v8 = vmax.f32 %v622_v63, %v479_v60  ;;  %v611_v23 = vsel %vm536_vm2, %v485_v16, -inf }
 0x115   : > { %v397_v11 = vpop.f32.mrb[24].mxu0 }
 0x116   : > { %v623_v58 = vmax.f32 %v619_v7, %v476_v6  ;;  %v630_v12 = vmax.f32 %v626_v8, %v483_v1  ;;  %v473_v13 = vmax.f32 %v397_v11, 0.0  ;;  %v903_v15 = vpop.f32.mrb[25].mxu0 }
 0x118   : > { %v620_v18 = vmax.f32 %v616_v37, %v473_v13  ;;  %v627_v19 = vmax.f32 %v623_v58, %v480_v10 }
 0x11a   : > { %v624_v21 = vmax.f32 %v620_v18, %v477_v17  ;;  %v631_v62 = vmax.f32 %v627_v19, %v484_v14 }
 0x11c   : > { %v634_v24 = vmax.f32 %v630_v12, %v631_v62  ;;  %v628_v25 = vmax.f32 %v624_v21, %v481_v20 }
 0x11e   : > { %v632_v22 = vmax.f32 %v628_v25, %v611_v23 }
 0x120   : > { %v633_v26 = vmax.f32 %v632_v22, %v629_v0 }
 0x122   : > { %v635_v27 = vmax.f32 %v633_v26, %v634_v24 }
 0x124   : > { %v636_v28 = vrot.slane %v635_v27, 4 }
 0x126   : > { %v637_v30 = vmax.f32 %v635_v27, %v636_v28 }
 0x128   : > { %v638_v31 = vrot.slane %v637_v30, 2 }
 0x12a   : > { %v639_v32 = vmax.f32 %v637_v30, %v638_v31 }
 0x12c   : > { %v640_v33 = vrot.slane %v639_v32, 1 }
 0x12e   : > { %v641_v34 = vmax.f32 %v639_v32, %v640_v33 }
 0x130   : > { %973 = vmatmul.mubr.f32.vlgmr.msra.gmra.mrb[24].mxu1 %v641_v34 }
 0x203   : > { %v724_v29 = vpop.f32.mrb[24].mxu1 }
 0x204   : > { %v731_v35 = vrot.slane %v724_v29, %v730_v2  ;;  %v974_v36 = vpop.f32.mrb[25].mxu1 }
 0x206   : > { %732 = vst [vmem:[%s168_s30] sm:$0xff] %v731_v35 }
 0x207 PF: > { %s13_s12 = sadd.s32 1, %s1019_s12  }
 0x208   : > { %p10_p4 = scmp.ge.s32.totalorder %s13_s12, 4  }
 0x20a   :  { %12 = sbr.rel (!%p10_p4) target bundleno = 1 (0x1), region = 62 }

</bundles_post_ra>
